<compile_context>
chip_gen: v7x
topology: tpu7x:2x2x1
jax: 0.10.0
libtpu: 0.0.40
codegen_flags: <defaults>
</compile_context>

<pallas_src>
import functools

import jax
import jax.numpy as jnp
import numpy as np
from jax.experimental import pallas as pl
from jax.experimental.pallas import tpu as pltpu


def mha_kernel(q_ref, k_ref, v_ref, wq_ref, wk_ref, wv_ref, wo_ref, o_ref,
               *, n_heads, dk, dv, maskout, batch_block):
    # q_ref/k_ref/v_ref : (bb, T, dmodel) tile (compute dtype)
    # wq_ref/wk_ref     : (dmodel, H*dk)   fused per-head weights (compute dtype)
    # wv_ref            : (dmodel, H*dv)
    # wo_ref            : (dmodel, dmodel)
    # o_ref             : (bb, T, dmodel)  float32
    bb = batch_block
    T = q_ref.shape[1]
    dmodel = q_ref.shape[2]
    cdt = wq_ref.dtype                       # compute (matmul-input) dtype
    approx = cdt != jnp.float32              # EUP approx reciprocal on fast path only

    # Fold (bb, T) -> bb*T so each projection is ONE wide MXU matmul.
    q = q_ref[...].reshape(bb * T, dmodel)
    k = k_ref[...].reshape(bb * T, dmodel)
    v = v_ref[...].reshape(bb * T, dmodel)

    inv_sqrt_dk = jnp.float32(1.0 / np.sqrt(dk))

    qp_all = jnp.dot(q, wq_ref[...], preferred_element_type=jnp.float32)   # (bb*T, H*dk)
    kp_all = jnp.dot(k, wk_ref[...], preferred_element_type=jnp.float32)   # (bb*T, H*dk)
    vp_all = jnp.dot(v, wv_ref[...], preferred_element_type=jnp.float32)   # (bb*T, H*dv)

    # Apply the 1/sqrt(dk) scale once to Qp (much smaller than the score
    # tensor for large T), still inside the kernel and in f32.
    qp_all = (qp_all * inv_sqrt_dk).reshape(bb, T, n_heads * dk).astype(cdt)
    kp_all = kp_all.reshape(bb, T, n_heads * dk).astype(cdt)
    vp_all = vp_all.reshape(bb, T, n_heads * dv).astype(cdt)

    if maskout:
        # sT rows = key index t, cols = query index q; key t visible iff t <= q.
        key_idx = jax.lax.broadcasted_iota(jnp.int32, (T, T), 0)
        qry_idx = jax.lax.broadcasted_iota(jnp.int32, (T, T), 1)
        allowed = key_idx <= qry_idx

    per_batch_out = []
    for b in range(bb):                       # small static trip counts -> unrolled
        head_outs = []
        for h in range(n_heads):
            qp = qp_all[b, :, h * dk:(h + 1) * dk]     # (Tq, dk)  (already scaled)
            kp = kp_all[b, :, h * dk:(h + 1) * dk]     # (Tk, dk)
            vp = vp_all[b, :, h * dv:(h + 1) * dv]     # (Tk, dv)

            # Transposed scores sT[t, q] = <k_t, q_q>/sqrt(dk): the softmax
            # reduction lands on the lane (last) axis.
            sT = jax.lax.dot_general(kp, qp, (((1,), (1,)), ((), ())),
                                     preferred_element_type=jnp.float32)
            if maskout:
                sT = jnp.where(allowed, sT, jnp.float32(-1e30))

            # Softmax over the *query* axis (dim 2 of (B,H,Tq,Tk) in the
            # PyTorch reference) == last axis of sT.  Kept in f32.
            m = jnp.max(sT, axis=-1, keepdims=True)
            e = jnp.exp(sT - m)
            pT = e * pl.reciprocal(jnp.sum(e, axis=-1, keepdims=True), approx=approx)

            # head[q, v] = sum_t pT[t, q] * vp[t, v]  (contract the key axis;
            # dot_general dimension numbers, no explicit transpose).
            head = jax.lax.dot_general(pT.astype(cdt), vp, (((0,), (0,)), ((), ())),
                                       preferred_element_type=jnp.float32)   # (Tq, dv)
            head_outs.append(head)
        per_batch_out.append(jnp.concatenate(head_outs, axis=-1))             # (T, H*dv)

    # Single fused output projection for all heads (and all bb batch rows).
    concat = jnp.concatenate(per_batch_out, axis=0).astype(cdt)               # (bb*T, dmodel)
    out = jnp.dot(concat, wo_ref[...], preferred_element_type=jnp.float32)    # (bb*T, dmodel)
    o_ref[...] = out.reshape(bb, T, dmodel).astype(o_ref.dtype)


def multi_head_attention(Q, K, V, Wq, Wk, Wv, Wo, *, maskout=False,
                         compute_dtype=jnp.bfloat16, batch_block=1):
    B, T, dmodel = Q.shape
    n_heads, _, dk = Wq.shape
    dv = Wv.shape[-1]
    assert n_heads * dv == dmodel, "H * dv must equal dmodel (as the PyTorch view requires)"
    assert B % batch_block == 0, "batch_block must divide B"
    bb = batch_block
    cdt = jnp.dtype(compute_dtype)

    # Fuse the per-head projection weights into lane-wide 2-D matrices (done
    # once, outside the kernel) and cast weights/activations to the compute
    # dtype (bf16 by default): fills the MXU lane dimension and halves DMA.
    Wq2 = jnp.moveaxis(Wq, 0, 1).reshape(dmodel, n_heads * dk).astype(cdt)
    Wk2 = jnp.moveaxis(Wk, 0, 1).reshape(dmodel, n_heads * dk).astype(cdt)
    Wv2 = jnp.moveaxis(Wv, 0, 1).reshape(dmodel, n_heads * dv).astype(cdt)
    Wo2 = Wo.astype(cdt)
    Qc, Kc, Vc = (x.astype(cdt) for x in (Q, K, V))

    kernel = functools.partial(mha_kernel, n_heads=n_heads, dk=dk, dv=dv,
                               maskout=maskout, batch_block=bb)

    # Advisory cost estimate for XLA scheduling around the custom call.
    itemsize = cdt.itemsize
    flops = (2 * B * T * dmodel * n_heads * (2 * dk + dv)      # Q/K/V projections
             + 2 * B * n_heads * T * T * (dk + dv)             # scores + attn @ V
             + 2 * B * T * dmodel * dmodel)                    # output projection
    transcendentals = B * n_heads * T * T                      # softmax exp
    bytes_accessed = (3 * B * T * dmodel * itemsize                              # Q, K, V
                      + (dmodel * n_heads * (2 * dk + dv) + dmodel * dmodel) * itemsize  # weights
                      + B * T * dmodel * 4)                                      # f32 output
    cost = pl.CostEstimate(flops=flops, transcendentals=transcendentals,
                           bytes_accessed=bytes_accessed)

    return pl.pallas_call(
        kernel,
        out_shape=jax.ShapeDtypeStruct((B, T, dmodel), jnp.float32),
        grid_spec=pltpu.PrefetchScalarGridSpec(
            num_scalar_prefetch=0,
            grid=(B // bb,),
            in_specs=[
                pl.BlockSpec((bb, T, dmodel), lambda b: (b, 0, 0)),          # Q
                pl.BlockSpec((bb, T, dmodel), lambda b: (b, 0, 0)),          # K
                pl.BlockSpec((bb, T, dmodel), lambda b: (b, 0, 0)),          # V
                pl.BlockSpec((dmodel, n_heads * dk), lambda b: (0, 0)),      # Wq (fused)
                pl.BlockSpec((dmodel, n_heads * dk), lambda b: (0, 0)),      # Wk (fused)
                pl.BlockSpec((dmodel, n_heads * dv), lambda b: (0, 0)),      # Wv (fused)
                pl.BlockSpec((dmodel, dmodel), lambda b: (0, 0)),            # Wo
            ],
            out_specs=pl.BlockSpec((bb, T, dmodel), lambda b: (b, 0, 0)),
        ),
        compiler_params=pltpu.CompilerParams(
            dimension_semantics=("parallel",)),     # batch axis shards across v7x's 2 TCs
        cost_estimate=cost,
    )(Qc, Kc, Vc, Wq2, Wk2, Wv2, Wo2)


def mha_reference(Q, K, V, Wq, Wk, Wv, Wo, *, maskout=False, compute_dtype=jnp.float32):
    """Pure-JAX transcription of the PyTorch forward (for verification).

    `compute_dtype` emulates the kernel's cast-to-compute-dtype rounding points
    (math itself stays f32) so the bf16 fast path can be checked tightly; the
    1/sqrt(dk) scale is folded into Qp exactly as in the kernel (identical in
    exact arithmetic to the PyTorch post-matmul division).
    """
    def c(x):
        return x.astype(compute_dtype).astype(jnp.float32)

    dk = Wq.shape[-1]
    Qp = jnp.einsum('btd,hdk->bhtk', c(Q), c(Wq)) / np.sqrt(dk)
    Kp = jnp.einsum('btd,hdk->bhtk', c(K), c(Wk))
    Vp = jnp.einsum('btd,hdv->bhtv', c(V), c(Wv))
    heads = jnp.einsum('bhqk,bhtk->bhqt', c(Qp), c(Kp))
    if maskout:
        T = Q.shape[1]
        mask = jnp.where(jnp.tril(jnp.ones((T, T))) == 0, -jnp.inf, 0.0)
        heads = heads + mask
    attn = jax.nn.softmax(heads, axis=2)            # dim=2, exactly like the reference
    hv = jnp.einsum('bhqt,bhtv->bhqv', c(attn), c(Vp))     # (B, H, T, dv)
    hv = jnp.transpose(hv, (0, 2, 1, 3))                   # (B, T, H, dv)
    B, T, H, dv = hv.shape
    hv = hv.reshape(B, T, H * dv)
    return jnp.matmul(c(hv), c(Wo))


if __name__ == "__main__":
    # Small shapes consistent with the module: H * dv == dmodel.
    B, T, dmodel = 2, 8, 32
    n_heads, dk, dv = 4, 8, 8

    key = jax.random.PRNGKey(0)
    kq, kk, kv, kwq, kwk, kwv, kwo = jax.random.split(key, 7)

    Q = jax.random.normal(kq, (B, T, dmodel), dtype=jnp.float32)
    K = jax.random.normal(kk, (B, T, dmodel), dtype=jnp.float32)
    V = jax.random.normal(kv, (B, T, dmodel), dtype=jnp.float32)

    Wq = jax.random.uniform(kwq, (n_heads, dmodel, dk), jnp.float32, -1.0, 1.0)
    Wk = jax.random.uniform(kwk, (n_heads, dmodel, dk), jnp.float32, -1.0, 1.0)
    Wv = jax.random.uniform(kwv, (n_heads, dmodel, dv), jnp.float32, -1.0, 1.0)
    Wo = jax.random.uniform(kwo, (dmodel, dmodel), jnp.float32, -1.0, 1.0)

    # 1) f32 compute path (exact softmax reciprocal): tight check vs the reference.
    out_f32 = jax.block_until_ready(
        multi_head_attention(Q, K, V, Wq, Wk, Wv, Wo, compute_dtype=jnp.float32))
    ref_f32 = mha_reference(Q, K, V, Wq, Wk, Wv, Wo)
    np.testing.assert_allclose(np.asarray(out_f32), np.asarray(ref_f32),
                               rtol=1e-4, atol=1e-4)

    # 2) default bf16 fast path vs a reference with identical bf16 rounding points.
    out_bf16 = jax.block_until_ready(multi_head_attention(Q, K, V, Wq, Wk, Wv, Wo))
    ref_bf16 = np.asarray(mha_reference(Q, K, V, Wq, Wk, Wv, Wo,
                                        compute_dtype=jnp.bfloat16))
    scale = np.max(np.abs(ref_bf16))
    np.testing.assert_allclose(np.asarray(out_bf16), ref_bf16,
                               rtol=0.0, atol=2e-2 * scale)

    # 3) causal-mask path + batch_block=2 (single grid step, folded B*T projections).
    out_m = jax.block_until_ready(
        multi_head_attention(Q, K, V, Wq, Wk, Wv, Wo, maskout=True,
                             compute_dtype=jnp.float32, batch_block=2))
    ref_m = mha_reference(Q, K, V, Wq, Wk, Wv, Wo, maskout=True)
    np.testing.assert_allclose(np.asarray(out_m), np.asarray(ref_m),
                               rtol=1e-4, atol=1e-4)

    print("KERNEL_OK")
</pallas_src>

<mosaic_0001>
module attributes {stable_mosaic.version = 11 : i64} {
  func.func @mha_kernel(%arg0: i32, %arg1: memref<1x8x32xf32, #tpu.memory_space<vmem>>, %arg2: memref<1x8x32xf32, #tpu.memory_space<vmem>>, %arg3: memref<1x8x32xf32, #tpu.memory_space<vmem>>, %arg4: memref<32x32xf32, #tpu.memory_space<vmem>>, %arg5: memref<32x32xf32, #tpu.memory_space<vmem>>, %arg6: memref<32x32xf32, #tpu.memory_space<vmem>>, %arg7: memref<32x32xf32, #tpu.memory_space<vmem>>, %arg8: memref<1x8x32xf32, #tpu.memory_space<vmem>>) attributes {dimension_semantics = [#tpu.dimension_semantics<parallel>], iteration_bounds = array<i64: 2>, scalar_prefetch = 0 : i64, scratch_operands = 0 : i64, tpu.core_type = #tpu.core_type<tc>, window_params = [{transform_indices = @transform_0, window_bounds = array<i64: 1, 8, 32>}, {transform_indices = @transform_1, window_bounds = array<i64: 1, 8, 32>}, {transform_indices = @transform_2, window_bounds = array<i64: 1, 8, 32>}, {pipeline_mode = #tpu.pipeline_mode<synchronous>, transform_indices = @transform_3, window_bounds = array<i64: 32, 32>}, {pipeline_mode = #tpu.pipeline_mode<synchronous>, transform_indices = @transform_4, window_bounds = array<i64: 32, 32>}, {pipeline_mode = #tpu.pipeline_mode<synchronous>, transform_indices = @transform_5, window_bounds = array<i64: 32, 32>}, {pipeline_mode = #tpu.pipeline_mode<synchronous>, transform_indices = @transform_6, window_bounds = array<i64: 32, 32>}, {transform_indices = @transform_7, window_bounds = array<i64: 1, 8, 32>}]} {
    %c0 = arith.constant 0 : index
    %c0_0 = arith.constant 0 : index
    %c0_1 = arith.constant 0 : index
    %0 = vector.load %arg1[%c0, %c0_0, %c0_1] : memref<1x8x32xf32, #tpu.memory_space<vmem>>, vector<1x8x32xf32>
    %1 = vector.shape_cast %0 : vector<1x8x32xf32> to vector<8x32xf32>
    %c0_2 = arith.constant 0 : index
    %c0_3 = arith.constant 0 : index
    %c0_4 = arith.constant 0 : index
    %2 = vector.load %arg2[%c0_2, %c0_3, %c0_4] : memref<1x8x32xf32, #tpu.memory_space<vmem>>, vector<1x8x32xf32>
    %3 = vector.shape_cast %2 : vector<1x8x32xf32> to vector<8x32xf32>
    %c0_5 = arith.constant 0 : index
    %c0_6 = arith.constant 0 : index
    %c0_7 = arith.constant 0 : index
    %4 = vector.load %arg3[%c0_5, %c0_6, %c0_7] : memref<1x8x32xf32, #tpu.memory_space<vmem>>, vector<1x8x32xf32>
    %5 = vector.shape_cast %4 : vector<1x8x32xf32> to vector<8x32xf32>
    %c0_8 = arith.constant 0 : index
    %c0_9 = arith.constant 0 : index
    %6 = vector.load %arg4[%c0_8, %c0_9] : memref<32x32xf32, #tpu.memory_space<vmem>>, vector<32x32xf32>
    %cst = arith.constant dense<0.000000e+00> : vector<8x32xf32>
    %7 = tpu.matmul %1, %6, %cst {dimension_numbers = #tpu.dot_dimension_numbers<[1], [0], [0], [1], [0, 0, 1, 1], [], []>} : vector<8x32xf32>, vector<32x32xf32>, vector<8x32xf32> -> vector<8x32xf32>
    %c0_10 = arith.constant 0 : index
    %c0_11 = arith.constant 0 : index
    %8 = vector.load %arg5[%c0_10, %c0_11] : memref<32x32xf32, #tpu.memory_space<vmem>>, vector<32x32xf32>
    %cst_12 = arith.constant dense<0.000000e+00> : vector<8x32xf32>
    %9 = tpu.matmul %3, %8, %cst_12 {dimension_numbers = #tpu.dot_dimension_numbers<[1], [0], [0], [1], [0, 0, 1, 1], [], []>} : vector<8x32xf32>, vector<32x32xf32>, vector<8x32xf32> -> vector<8x32xf32>
    %c0_13 = arith.constant 0 : index
    %c0_14 = arith.constant 0 : index
    %10 = vector.load %arg6[%c0_13, %c0_14] : memref<32x32xf32, #tpu.memory_space<vmem>>, vector<32x32xf32>
    %cst_15 = arith.constant dense<0.000000e+00> : vector<8x32xf32>
    %11 = tpu.matmul %5, %10, %cst_15 {dimension_numbers = #tpu.dot_dimension_numbers<[1], [0], [0], [1], [0, 0, 1, 1], [], []>} : vector<8x32xf32>, vector<32x32xf32>, vector<8x32xf32> -> vector<8x32xf32>
    %cst_16 = arith.constant 0.353553385 : f32
    %12 = vector.broadcast %cst_16 : f32 to vector<8x32xf32>
    %13 = arith.mulf %7, %12 : vector<8x32xf32>
    %14 = vector.shape_cast %13 : vector<8x32xf32> to vector<1x8x32xf32>
    %15 = vector.shape_cast %9 : vector<8x32xf32> to vector<1x8x32xf32>
    %16 = vector.shape_cast %11 : vector<8x32xf32> to vector<1x8x32xf32>
    %17 = vector.extract_strided_slice %14 {offsets = [0, 0, 0], sizes = [1, 8, 8], strides = [1, 1, 1]} : vector<1x8x32xf32> to vector<1x8x8xf32>
    %18 = vector.shape_cast %17 : vector<1x8x8xf32> to vector<8x8xf32>
    %19 = vector.extract_strided_slice %15 {offsets = [0, 0, 0], sizes = [1, 8, 8], strides = [1, 1, 1]} : vector<1x8x32xf32> to vector<1x8x8xf32>
    %20 = vector.shape_cast %19 : vector<1x8x8xf32> to vector<8x8xf32>
    %21 = vector.extract_strided_slice %16 {offsets = [0, 0, 0], sizes = [1, 8, 8], strides = [1, 1, 1]} : vector<1x8x32xf32> to vector<1x8x8xf32>
    %22 = vector.shape_cast %21 : vector<1x8x8xf32> to vector<8x8xf32>
    %cst_17 = arith.constant dense<0.000000e+00> : vector<8x8xf32>
    %23 = tpu.matmul %20, %18, %cst_17 {dimension_numbers = #tpu.dot_dimension_numbers<[1], [1], [0], [0], [0, 0, 1, 0], [], []>} : vector<8x8xf32>, vector<8x8xf32>, vector<8x8xf32> -> vector<8x8xf32>
    %cst_18 = arith.constant dense<0xFF800000> : vector<8xf32>
    %24 = vector.multi_reduction <maximumf>, %23, %cst_18 [1] : vector<8x8xf32> to vector<8xf32>
    %25 = vector.shape_cast %24 : vector<8xf32> to vector<8x1xf32>
    %26 = vector.broadcast %25 : vector<8x1xf32> to vector<8x8xf32>
    %27 = arith.subf %23, %26 : vector<8x8xf32>
    %28 = math.exp %27 : vector<8x8xf32>
    %cst_19 = arith.constant dense<0.000000e+00> : vector<8xf32>
    %29 = vector.multi_reduction <add>, %28, %cst_19 [1] : vector<8x8xf32> to vector<8xf32>
    %30 = vector.shape_cast %29 : vector<8xf32> to vector<8x1xf32>
    %31 = tpu.reciprocal %30 : vector<8x1xf32> -> vector<8x1xf32>
    %32 = vector.broadcast %31 : vector<8x1xf32> to vector<8x8xf32>
    %33 = arith.mulf %28, %32 : vector<8x8xf32>
    %cst_20 = arith.constant dense<0.000000e+00> : vector<8x8xf32>
    %34 = tpu.matmul %33, %22, %cst_20 {dimension_numbers = #tpu.dot_dimension_numbers<[0], [0], [1], [1], [0, 1, 1, 1], [], []>} : vector<8x8xf32>, vector<8x8xf32>, vector<8x8xf32> -> vector<8x8xf32>
    %35 = vector.extract_strided_slice %14 {offsets = [0, 0, 8], sizes = [1, 8, 8], strides = [1, 1, 1]} : vector<1x8x32xf32> to vector<1x8x8xf32>
    %36 = vector.shape_cast %35 : vector<1x8x8xf32> to vector<8x8xf32>
    %37 = vector.extract_strided_slice %15 {offsets = [0, 0, 8], sizes = [1, 8, 8], strides = [1, 1, 1]} : vector<1x8x32xf32> to vector<1x8x8xf32>
    %38 = vector.shape_cast %37 : vector<1x8x8xf32> to vector<8x8xf32>
    %39 = vector.extract_strided_slice %16 {offsets = [0, 0, 8], sizes = [1, 8, 8], strides = [1, 1, 1]} : vector<1x8x32xf32> to vector<1x8x8xf32>
    %40 = vector.shape_cast %39 : vector<1x8x8xf32> to vector<8x8xf32>
    %cst_21 = arith.constant dense<0.000000e+00> : vector<8x8xf32>
    %41 = tpu.matmul %38, %36, %cst_21 {dimension_numbers = #tpu.dot_dimension_numbers<[1], [1], [0], [0], [0, 0, 1, 0], [], []>} : vector<8x8xf32>, vector<8x8xf32>, vector<8x8xf32> -> vector<8x8xf32>
    %cst_22 = arith.constant dense<0xFF800000> : vector<8xf32>
    %42 = vector.multi_reduction <maximumf>, %41, %cst_22 [1] : vector<8x8xf32> to vector<8xf32>
    %43 = vector.shape_cast %42 : vector<8xf32> to vector<8x1xf32>
    %44 = vector.broadcast %43 : vector<8x1xf32> to vector<8x8xf32>
    %45 = arith.subf %41, %44 : vector<8x8xf32>
    %46 = math.exp %45 : vector<8x8xf32>
    %cst_23 = arith.constant dense<0.000000e+00> : vector<8xf32>
    %47 = vector.multi_reduction <add>, %46, %cst_23 [1] : vector<8x8xf32> to vector<8xf32>
    %48 = vector.shape_cast %47 : vector<8xf32> to vector<8x1xf32>
    %49 = tpu.reciprocal %48 : vector<8x1xf32> -> vector<8x1xf32>
    %50 = vector.broadcast %49 : vector<8x1xf32> to vector<8x8xf32>
    %51 = arith.mulf %46, %50 : vector<8x8xf32>
    %cst_24 = arith.constant dense<0.000000e+00> : vector<8x8xf32>
    %52 = tpu.matmul %51, %40, %cst_24 {dimension_numbers = #tpu.dot_dimension_numbers<[0], [0], [1], [1], [0, 1, 1, 1], [], []>} : vector<8x8xf32>, vector<8x8xf32>, vector<8x8xf32> -> vector<8x8xf32>
    %53 = vector.extract_strided_slice %14 {offsets = [0, 0, 16], sizes = [1, 8, 8], strides = [1, 1, 1]} : vector<1x8x32xf32> to vector<1x8x8xf32>
    %54 = vector.shape_cast %53 : vector<1x8x8xf32> to vector<8x8xf32>
    %55 = vector.extract_strided_slice %15 {offsets = [0, 0, 16], sizes = [1, 8, 8], strides = [1, 1, 1]} : vector<1x8x32xf32> to vector<1x8x8xf32>
    %56 = vector.shape_cast %55 : vector<1x8x8xf32> to vector<8x8xf32>
    %57 = vector.extract_strided_slice %16 {offsets = [0, 0, 16], sizes = [1, 8, 8], strides = [1, 1, 1]} : vector<1x8x32xf32> to vector<1x8x8xf32>
    %58 = vector.shape_cast %57 : vector<1x8x8xf32> to vector<8x8xf32>
    %cst_25 = arith.constant dense<0.000000e+00> : vector<8x8xf32>
    %59 = tpu.matmul %56, %54, %cst_25 {dimension_numbers = #tpu.dot_dimension_numbers<[1], [1], [0], [0], [0, 0, 1, 0], [], []>} : vector<8x8xf32>, vector<8x8xf32>, vector<8x8xf32> -> vector<8x8xf32>
    %cst_26 = arith.constant dense<0xFF800000> : vector<8xf32>
    %60 = vector.multi_reduction <maximumf>, %59, %cst_26 [1] : vector<8x8xf32> to vector<8xf32>
    %61 = vector.shape_cast %60 : vector<8xf32> to vector<8x1xf32>
    %62 = vector.broadcast %61 : vector<8x1xf32> to vector<8x8xf32>
    %63 = arith.subf %59, %62 : vector<8x8xf32>
    %64 = math.exp %63 : vector<8x8xf32>
    %cst_27 = arith.constant dense<0.000000e+00> : vector<8xf32>
    %65 = vector.multi_reduction <add>, %64, %cst_27 [1] : vector<8x8xf32> to vector<8xf32>
    %66 = vector.shape_cast %65 : vector<8xf32> to vector<8x1xf32>
    %67 = tpu.reciprocal %66 : vector<8x1xf32> -> vector<8x1xf32>
    %68 = vector.broadcast %67 : vector<8x1xf32> to vector<8x8xf32>
    %69 = arith.mulf %64, %68 : vector<8x8xf32>
    %cst_28 = arith.constant dense<0.000000e+00> : vector<8x8xf32>
    %70 = tpu.matmul %69, %58, %cst_28 {dimension_numbers = #tpu.dot_dimension_numbers<[0], [0], [1], [1], [0, 1, 1, 1], [], []>} : vector<8x8xf32>, vector<8x8xf32>, vector<8x8xf32> -> vector<8x8xf32>
    %71 = vector.extract_strided_slice %14 {offsets = [0, 0, 24], sizes = [1, 8, 8], strides = [1, 1, 1]} : vector<1x8x32xf32> to vector<1x8x8xf32>
    %72 = vector.shape_cast %71 : vector<1x8x8xf32> to vector<8x8xf32>
    %73 = vector.extract_strided_slice %15 {offsets = [0, 0, 24], sizes = [1, 8, 8], strides = [1, 1, 1]} : vector<1x8x32xf32> to vector<1x8x8xf32>
    %74 = vector.shape_cast %73 : vector<1x8x8xf32> to vector<8x8xf32>
    %75 = vector.extract_strided_slice %16 {offsets = [0, 0, 24], sizes = [1, 8, 8], strides = [1, 1, 1]} : vector<1x8x32xf32> to vector<1x8x8xf32>
    %76 = vector.shape_cast %75 : vector<1x8x8xf32> to vector<8x8xf32>
    %cst_29 = arith.constant dense<0.000000e+00> : vector<8x8xf32>
    %77 = tpu.matmul %74, %72, %cst_29 {dimension_numbers = #tpu.dot_dimension_numbers<[1], [1], [0], [0], [0, 0, 1, 0], [], []>} : vector<8x8xf32>, vector<8x8xf32>, vector<8x8xf32> -> vector<8x8xf32>
    %cst_30 = arith.constant dense<0xFF800000> : vector<8xf32>
    %78 = vector.multi_reduction <maximumf>, %77, %cst_30 [1] : vector<8x8xf32> to vector<8xf32>
    %79 = vector.shape_cast %78 : vector<8xf32> to vector<8x1xf32>
    %80 = vector.broadcast %79 : vector<8x1xf32> to vector<8x8xf32>
    %81 = arith.subf %77, %80 : vector<8x8xf32>
    %82 = math.exp %81 : vector<8x8xf32>
    %cst_31 = arith.constant dense<0.000000e+00> : vector<8xf32>
    %83 = vector.multi_reduction <add>, %82, %cst_31 [1] : vector<8x8xf32> to vector<8xf32>
    %84 = vector.shape_cast %83 : vector<8xf32> to vector<8x1xf32>
    %85 = tpu.reciprocal %84 : vector<8x1xf32> -> vector<8x1xf32>
    %86 = vector.broadcast %85 : vector<8x1xf32> to vector<8x8xf32>
    %87 = arith.mulf %82, %86 : vector<8x8xf32>
    %cst_32 = arith.constant dense<0.000000e+00> : vector<8x8xf32>
    %88 = tpu.matmul %87, %76, %cst_32 {dimension_numbers = #tpu.dot_dimension_numbers<[0], [0], [1], [1], [0, 1, 1, 1], [], []>} : vector<8x8xf32>, vector<8x8xf32>, vector<8x8xf32> -> vector<8x8xf32>
    %89 = tpu.concatenate %34, %52, %70, %88 in 1 : vector<8x8xf32>, vector<8x8xf32>, vector<8x8xf32>, vector<8x8xf32> -> vector<8x32xf32>
    %c0_33 = arith.constant 0 : index
    %c0_34 = arith.constant 0 : index
    %90 = vector.load %arg7[%c0_33, %c0_34] : memref<32x32xf32, #tpu.memory_space<vmem>>, vector<32x32xf32>
    %cst_35 = arith.constant dense<0.000000e+00> : vector<8x32xf32>
    %91 = tpu.matmul %89, %90, %cst_35 {dimension_numbers = #tpu.dot_dimension_numbers<[1], [0], [0], [1], [0, 0, 1, 1], [], []>} : vector<8x32xf32>, vector<32x32xf32>, vector<8x32xf32> -> vector<8x32xf32>
    %92 = vector.shape_cast %91 : vector<8x32xf32> to vector<1x8x32xf32>
    %c0_36 = arith.constant 0 : index
    %c0_37 = arith.constant 0 : index
    %c0_38 = arith.constant 0 : index
    %93 = vector.load %arg8[%c0_36, %c0_37, %c0_38] : memref<1x8x32xf32, #tpu.memory_space<vmem>>, vector<1x8x32xf32>
    tpu.vector_store %arg8[%c0_36, %c0_37, %c0_38], %92 {strides = array<i32>} : memref<1x8x32xf32, #tpu.memory_space<vmem>>, vector<1x8x32xf32>,
    return
  }
  func.func @transform_0(%arg0: i32) -> (i32, i32, i32) {
    %c0_i32 = arith.constant 0 : i32
    %c0_i32_0 = arith.constant 0 : i32
    %c0_i32_1 = arith.constant 0 : i32
    return %arg0, %c0_i32, %c0_i32_0 : i32, i32, i32
  }
  func.func @transform_1(%arg0: i32) -> (i32, i32, i32) {
    %c0_i32 = arith.constant 0 : i32
    %c0_i32_0 = arith.constant 0 : i32
    %c0_i32_1 = arith.constant 0 : i32
    return %arg0, %c0_i32, %c0_i32_0 : i32, i32, i32
  }
  func.func @transform_2(%arg0: i32) -> (i32, i32, i32) {
    %c0_i32 = arith.constant 0 : i32
    %c0_i32_0 = arith.constant 0 : i32
    %c0_i32_1 = arith.constant 0 : i32
    return %arg0, %c0_i32, %c0_i32_0 : i32, i32, i32
  }
  func.func @transform_3(%arg0: i32) -> (i32, i32) {
    %c0_i32 = arith.constant 0 : i32
    %c0_i32_0 = arith.constant 0 : i32
    %c0_i32_1 = arith.constant 0 : i32
    return %c0_i32, %c0_i32_0 : i32, i32
  }
  func.func @transform_4(%arg0: i32) -> (i32, i32) {
    %c0_i32 = arith.constant 0 : i32
    %c0_i32_0 = arith.constant 0 : i32
    %c0_i32_1 = arith.constant 0 : i32
    return %c0_i32, %c0_i32_0 : i32, i32
  }
  func.func @transform_5(%arg0: i32) -> (i32, i32) {
    %c0_i32 = arith.constant 0 : i32
    %c0_i32_0 = arith.constant 0 : i32
    %c0_i32_1 = arith.constant 0 : i32
    return %c0_i32, %c0_i32_0 : i32, i32
  }
  func.func @transform_6(%arg0: i32) -> (i32, i32) {
    %c0_i32 = arith.constant 0 : i32
    %c0_i32_0 = arith.constant 0 : i32
    %c0_i32_1 = arith.constant 0 : i32
    return %c0_i32, %c0_i32_0 : i32, i32
  }
  func.func @transform_7(%arg0: i32) -> (i32, i32, i32) {
    %c0_i32 = arith.constant 0 : i32
    %c0_i32_0 = arith.constant 0 : i32
    %c0_i32_1 = arith.constant 0 : i32
    return %arg0, %c0_i32, %c0_i32_0 : i32, i32, i32
  }
}

</mosaic_0001>

<bundles_post_ra>
// kernel: tpu_custom_call.1
= control target key start
LH: loop header
LB: loop body
LE: loop exit
PB: predicated region body
PF: predicated region fallthrough
CT: control target
= control target key end

     0   :  { %s2803_s0 = inlined_call_operand.hbm [shape: f32[2,8,32], index: 0, kind: input, shape index: {}]   ;;  %s2804_s1 = inlined_call_operand.hbm [shape: f32[2,8,32], index: 1, kind: input, shape index: {}]   ;;  %s2805_s2 = inlined_call_operand.hbm [shape: f32[2,8,32], index: 2, kind: input, shape index: {}]   ;;  %s2806_s3 = inlined_call_operand.hbm [shape: f32[32,32], index: 3, kind: input, shape index: {}]   ;;  %s2807_s4 = inlined_call_operand.hbm [shape: f32[32,32], index: 4, kind: input, shape index: {}]   ;;  %s2808_s5 = inlined_call_operand.hbm [shape: f32[32,32], index: 5, kind: input, shape index: {}]   ;;  %s2809_s6 = inlined_call_operand.hbm [shape: f32[32,32], index: 6, kind: input, shape index: {}]   ;;  %s2810_s7 = inlined_call_operand.hbm [shape: f32[2,8,32], index: 7, kind: output, shape index: {}]  }
   0x1   :  { %2834 = sst [smem:[#allocation25_spill]] %s2804_s1 }
   0x2   :  { %2835 = sst [smem:[#allocation26_spill]] %s2806_s3 }
   0x3   :  { %2836 = sst [smem:[#allocation27_spill]] %s2808_s5 }
   0x4   :  { %2837 = sst [smem:[#allocation28_spill]] %s2810_s7 }
   0x5   :  { %12 = vsyncpa [#allocation3], 0 }
   0x6   :  { %14 = vsyncpa [#allocation3 + $0x1], 0 }
   0x7   :  { %15 = vsyncpa [#allocation6], 0 }
   0x8   :  { %17 = vsyncpa [#allocation6 + $0x1], 0 }
   0x9   :  { %18 = vsyncpa [#allocation9], 0 }
   0xa   :  { %19 = vsyncpa [#allocation12], 0 }
   0xb   :  { %20 = vsyncpa [#allocation4], 0 }
   0xc   :  { %22 = vsyncpa [#allocation4 + $0x1], 0  ;;  %s2355_s24 = smov 0   ;;  %s2357_s25 = smov 0  }
   0xd   :  { %s2359_s26 = smov 0   ;;  %s2361_s27 = smov 0  }
   0xe LB: > { %2838 = sst [smem:[#allocation20_spill]] %s2282_s24  ;;  %s2296_s28 = smov [#allocation8]   ;;  %s2294_s27 = sphi %s2361_s27, %s2875_s27   ;;  %s2290_s26 = sphi %s2359_s26, %s2879_s26   ;;  %s2286_s25 = sphi %s2357_s25, %s2878_s25   ;;  %s2282_s24 = sphi %s2355_s24, %s2877_s24  }
   0xf   : > { %2839 = sst [smem:[#allocation21_spill]] %s2294_s27  ;;  %s233_s29 = sshll.u32 %s2296_s28, 4  ;;  %s2381_s29 = int_to_ptr.vmem [resolvable:$true] %s233_s29 }
  0x10   : > { %s2376_s30 = sadd.s32 4294967295, %s2294_s27   ;;  %p1705_p0 = scmp.ge.s32.totalorder %s2294_s27, 1 }
  0x11   : > { %p2820_p1 = scmp.eq.s32.totalorder %s2376_s30, 0  ;;  %p221_p2 = scmp.lt.s32.totalorder %s2294_s27, 3 }
  0x12   : > { %s2297_s9 = smov [#allocation11]   ;;  %s2842_s3 = sld [smem:[#allocation26_spill]] }
  0x13   : > { %p2383_p3 = pnand %p1705_p0, %p221_p2  ;;  %s259_s10 = sshll.u32 %s2297_s9, 4  ;;  %s2396_s10 = int_to_ptr.vmem [resolvable:$true] %s259_s10 }
  0x15   : > { %s2840_s8 = scalar_select %p2383_p3, 1, 0 }
  0x16   : > { %p1914_p5 = pneg %p2383_p3 }
  0x18   : > { %p2392_p6 = pnand %p1914_p5, %p2820_p1  ;;  %s2014_s14 = scalar_lea.hbm %s2842_s3, 512 }
  0x19   : > { %p2015_p7 = scmp.ne.s32.totalorder %s2842_s3, %s2014_s14  ;;  %p2021_p11 = scmp.lt.u32.totalorder %s2014_s14, %s2842_s3 }
  0x1a   : > { %s2841_s11 = scalar_select %p2392_p6, 1, 0 }
  0x1b   : > { %p2406_p8 = pneg %p2392_p6 }
  0x1d   : > { %s2843_s17 = scalar_select %p2406_p8, 1, 0 }
  0x1e   : > { %p2017_p9 = pnand %p2406_p8, %p2015_p7 }
  0x20   : > { %p2018_p10 = pneg %p2017_p9 }
  0x22   : > { %p2023_p12 = pnand %p2021_p11, %p2018_p10 }
  0x24   : > { %2026 = shalt.err (!%p2023_p12)
}
  0x25   : > { %s2027_s20 = scalar_lea.vmem %s2381_s29, 512  ;;  %p2035_p5 = scmp.lt.s32.totalorder %s2381_s29, %s2381_s29 }
  0x26   : > { %p2028_p13 = scmp.ne.s32.totalorder %s2381_s29, %s2027_s20  ;;  %p2036_p4 = scmp.lt.s32.totalorder %s2027_s20, %s2027_s20 }
  0x28   : > { %p2030_p0 = pnand %p2028_p13, %p2406_p8  ;;  %p2037_p7 = por %p2036_p4, %p2035_p5 }
  0x2a   : > { %p2031_p2 = pneg %p2030_p0 }
  0x2c   : > { %p2038_p9 = pnand %p2037_p7, %p2031_p2 }
  0x2e   : > { %2041 = shalt.err (!%p2038_p9)
}
  0x2f   : > { %s2813_s21 = smov 128   ;;  %s2815_s22 = smov 8  }
  0x30   : > { %1917 = dma.hbm_to_vmem [thread:$0]  (!%p2392_p6), %s2842_s3, 512, %s2381_s29, [#allocation9], %s2813_s21, %s2813_s21, %s2815_s22  }
  0x31   : > { %s2844_s5 = sld [smem:[#allocation27_spill]] }
  0x37   : > { %s2042_s13 = scalar_lea.hbm %s2844_s5, 512 }
  0x38   : > { %p2043_p4 = scmp.ne.s32.totalorder %s2844_s5, %s2042_s13  ;;  %p2049_p12 = scmp.lt.u32.totalorder %s2042_s13, %s2844_s5 }
  0x3a   : > { %p2045_p10 = pnand %p2043_p4, %p2406_p8 }
  0x3c   : > { %p2046_p11 = pneg %p2045_p10 }
  0x3e   : > { %p2051_p13 = pnand %p2049_p12, %p2046_p11 }
  0x40   : > { %2054 = shalt.err (!%p2051_p13)
}
  0x41   : > { %s2055_s29 = scalar_lea.vmem %s2396_s10, 512  ;;  %p2063_p7 = scmp.lt.s32.totalorder %s2396_s10, %s2396_s10 }
  0x42   : > { %p2056_p0 = scmp.ne.s32.totalorder %s2396_s10, %s2055_s29  ;;  %p2064_p9 = scmp.lt.s32.totalorder %s2055_s29, %s2055_s29 }
  0x44   : > { %p2058_p2 = pnand %p2056_p0, %p2406_p8  ;;  %p2065_p4 = por %p2064_p9, %p2063_p7 }
  0x46   : > { %p2059_p5 = pneg %p2058_p2 }
  0x48   : > { %p2066_p10 = pnand %p2065_p4, %p2059_p5 }
  0x4a   : > { %2069 = shalt.err (!%p2066_p10)
}
  0x4b   : > { %1923 = dma.hbm_to_vmem [thread:$0]  (!%p2392_p6), %s2844_s5, 512, %s2396_s10, [#allocation12], %s2813_s21, %s2813_s21, %s2815_s22  }
  0x4c   : > { %s1704_s23 = sadd.s32 4294967294, %s2294_s27   ;;  %s2458_s28 = sadd.s32 1, %s2294_s27  }
  0x4d   : > { %2845 = sst [smem:[#allocation22_spill]] %s2458_s28  ;;  %s32_s9 = ssub.s32 %s2294_s27, %s2458_s28 }
  0x4e   : > { %s35_s12 = sadd.s32 1, %s2290_s26  ;;  %p33_p11 = scmp.eq.s32.totalorder %s32_s9, 0 }
  0x4f   : > { %p42_p12 = scmp.ne.s32.totalorder %s2290_s26, %s2286_s25  ;;  %p43_p13 = scmp.eq.s32.totalorder %s2294_s27, 0 }
  0x50   : > { %p48_p0 = scmp.ne.s32.totalorder %s2286_s25, %s2282_s24  ;;  %p208_p7 = scmp.eq.s32.totalorder %s2376_s30, 1 }
  0x51   : > { %s2469_s13 = scalar_select %p33_p11, %s2290_s26, %s35_s12  }
  0x52   : > { %p44_p2 = por %p43_p13, %p42_p12  ;;  %p2473_p5 = por %p2820_p1, %p48_p0 }
  0x53   : > { %2846 = sst [smem:[#allocation23_spill]] %s2469_s13  ;;  %p214_p9 = scmp.eq.s32.totalorder %s1704_s23, 1 }
  0x54   : > { %s2847_s14 = scalar_select %p2473_p5, 1, 0 }
  0x55   : > { %p1945_p4 = scmp.lt.s32.totalorder %s2294_s27, 2  ;;  %s2812_s10 = sand.u32 1, %s2290_s26  }
  0x56   : > { %p2480_p10 = por %p208_p7, %p42_p12  ;;  %p2484_p3 = por %p214_p9, %p48_p0 }
  0x57   : > { %s2490_s18 = sshll.u32 %s2812_s10, 3  ;;  %s2493_s29 = sshll.u32 %s2294_s27, 7 }
  0x58   : > { %s2848_s15 = scalar_select %p2480_p10, 1, 0 }
  0x59   : > { %s2849_s16 = scalar_select %p2484_p3, 1, 0 }
  0x5a   : > { %p2495_p11 = pnand %p1945_p4, %p44_p2  ;;  %s304_s20 = sand.u32 1, %s2294_s27  }
  0x5b   : > { %2850 = sst [smem:[#allocation24_spill]] %s2849_s16  ;;  %s308_s10 = scalar_lea.vmem [#allocation5], %s2490_s18 }
  0x5c   : > { %s2851_s19 = scalar_select %p2495_p11, 1, 0 }
  0x5d   : > { %s2852_s1 = sld [smem:[#allocation25_spill]]  ;;  %s315_s21 = sshll.u32 %s308_s10, 4  ;;  %s2507_s21 = int_to_ptr.vmem [resolvable:$true] %s315_s21 }
  0x5e   : > { %s2300_s22 = smov [#allocation10]   ;;  %s2511_s5 = scalar_lea.sflag [#allocation6], %s304_s20 }
  0x5f   : > { %s2509_s3 = sshll.u32 %s2300_s22, 4  ;;  %p2517_p13 = pneg %p2495_p11  ;;  %s247_s3 = int_to_ptr.vmem [resolvable:$true] %s2509_s3 }
  0x61   : > { %s2853_s23 = scalar_select %p2517_p13, 1, 0 }
  0x63   : > { %s2504_s12 = scalar_lea.hbm %s2852_s1, %s2493_s29  ;;  %s2075_s28 = scalar_lea.hbm %s2852_s1, 256 }
  0x64   : > { %s2070_s13 = scalar_lea.hbm %s2504_s12, 128  ;;  %p2076_p7 = scmp.lt.u32.totalorder %s2504_s12, %s2852_s1 }
  0x65   : > { %p2071_p12 = scmp.ne.s32.totalorder %s2504_s12, %s2070_s13  ;;  %p2077_p9 = scmp.lt.u32.totalorder %s2075_s28, %s2070_s13 }
  0x66   : > { %p2079_p1 = scmp.lt.u32.totalorder %s2070_s13, %s2504_s12 }
  0x67   : > { %p2073_p0 = pnand %p2517_p13, %p2071_p12  ;;  %p2078_p4 = por %p2077_p9, %p2076_p7 }
  0x69   : > { %p2074_p2 = pneg %p2073_p0  ;;  %p2080_p3 = por %p2079_p1, %p2078_p4 }
  0x6b   : > { %p2081_p10 = pnand %p2080_p3, %p2074_p2 }
  0x6d   : > { %2084 = shalt.err (!%p2081_p10)
}
  0x6e   : > { %s2085_s20 = scalar_lea.vmem %s2507_s21, 128  ;;  %s2301_s9 = smov [#allocation5]  }
  0x6f   : > { %p2086_p12 = scmp.ne.s32.totalorder %s2507_s21, %s2085_s20  ;;  %s2090_s10 = sshll.u32 %s2301_s9, 4  ;;  %s2091_s10 = int_to_ptr.vmem [resolvable:$false] %s2090_s10 }
  0x70   : > { %s2092_s27 = scalar_lea.vmem %s2091_s10, 256  ;;  %p2093_p6 = scmp.lt.s32.totalorder %s2507_s21, %s2091_s10 }
  0x71   : > { %p2088_p0 = pnand %p2086_p12, %p2517_p13  ;;  %p2094_p8 = scmp.lt.s32.totalorder %s2092_s27, %s2085_s20 }
  0x73   : > { %p2089_p5 = pneg %p2088_p0  ;;  %p2095_p7 = por %p2094_p8, %p2093_p6 }
  0x75   : > { %p2096_p9 = pnand %p2095_p7, %p2089_p5 }
  0x77   : > { %2099 = shalt.err (!%p2096_p9)
}
  0x78   : > { %1933 = dma.hbm_to_vmem [thread:$0]  (!%p2495_p11), %s2504_s12, 128, %s2507_s21, %s2511_s5  }
  0x79   : > { %s2100_s22 = scalar_lea.hbm %s2807_s4, 512  ;;  %p2854_p3 = scmp.ne.s32.totalorder %s2843_s17, 0 }
  0x7a   : > { %p2101_p1 = scmp.ne.s32.totalorder %s2807_s4, %s2100_s22  ;;  %p2107_p5 = scmp.lt.u32.totalorder %s2100_s22, %s2807_s4 }
  0x7c   : > { %p2103_p6 = pnand %p2101_p1, %p2854_p3 }
  0x7e   : > { %p2104_p8 = pneg %p2103_p6 }
  0x80   : > { %p2109_p10 = pnand %p2107_p5, %p2104_p8 }
  0x82   : > { %2112 = shalt.err (!%p2109_p10)
}
  0x83   : > { %s2113_s27 = scalar_lea.vmem %s247_s3, 512  ;;  %p2121_p0 = scmp.lt.s32.totalorder %s247_s3, %s247_s3 }
  0x84   : > { %p2114_p2 = scmp.ne.s32.totalorder %s247_s3, %s2113_s27  ;;  %p2122_p7 = scmp.lt.s32.totalorder %s2113_s27, %s2113_s27 }
  0x86   : > { %p2116_p4 = pnand %p2114_p2, %p2854_p3  ;;  %p2123_p9 = por %p2122_p7, %p2121_p0 }
  0x88   : > { %p2117_p12 = pneg %p2116_p4 }
  0x8a   : > { %p2124_p11 = pnand %p2123_p9, %p2117_p12 }
  0x8c   : > { %2127 = shalt.err (!%p2124_p11)
}
  0x8d   : > { %p2855_p1 = scmp.ne.s32.totalorder %s2841_s11, 0  ;;  %s2856_s1 = smov 8  }
  0x8e   : > { %s2857_s21 = smov 128   ;;  %s2302_s13 = smov [#allocation13]  }
  0x8f   : > { %1920 = dma.hbm_to_vmem [thread:$0]  (!%p2855_p1), %s2807_s4, 512, %s247_s3, [#allocation9], %s2857_s21, %s2857_s21, %s2856_s1  }
  0x90   : > { %s272_s22 = sshll.u32 %s2302_s13, 4  ;;  %s2128_s10 = scalar_lea.hbm %s2809_s6, 512  ;;  %s273_s22 = int_to_ptr.vmem [resolvable:$true] %s272_s22 }
  0x91   : > { %p2129_p11 = scmp.ne.s32.totalorder %s2809_s6, %s2128_s10  ;;  %p2135_p5 = scmp.lt.u32.totalorder %s2128_s10, %s2809_s6 }
  0x93   : > { %p2131_p6 = pnand %p2129_p11, %p2854_p3 }
  0x95   : > { %p2132_p8 = pneg %p2131_p6 }
  0x97   : > { %p2137_p10 = pnand %p2135_p5, %p2132_p8 }
  0x99   : > { %2140 = shalt.err (!%p2137_p10)
}
  0x9a   : > { %s2141_s3 = scalar_lea.vmem %s273_s22, 512  ;;  %p2149_p0 = scmp.lt.s32.totalorder %s273_s22, %s273_s22 }
  0x9b   : > { %p2142_p2 = scmp.ne.s32.totalorder %s273_s22, %s2141_s3  ;;  %p2150_p7 = scmp.lt.s32.totalorder %s2141_s3, %s2141_s3 }
  0x9d   : > { %p2144_p4 = pnand %p2142_p2, %p2854_p3  ;;  %p2151_p9 = por %p2150_p7, %p2149_p0 }
  0x9f   : > { %p2145_p12 = pneg %p2144_p4 }
  0xa1   : > { %p2152_p13 = pnand %p2151_p9, %p2145_p12 }
  0xa3   : > { %2155 = shalt.err (!%p2152_p13)
}
  0xa4   : > { %1926 = dma.hbm_to_vmem [thread:$0]  (!%p2855_p1), %s2809_s6, 512, %s273_s22, [#allocation12], %s2857_s21, %s2857_s21, %s2856_s1  }
  0xa5   : > { %s2588_s12 = scalar_lea.hbm %s2803_s0, %s2493_s29  ;;  %s290_s11 = scalar_lea.vmem [#allocation2], %s2490_s18 }
  0xa6   : > { %s297_s28 = sshll.u32 %s290_s11, 4  ;;  %s2858_s13 = sand.u32 1, %s2290_s26   ;;  %s298_s28 = int_to_ptr.vmem [resolvable:$true] %s297_s28 }
  0xa7   : > { %s287_s9 = scalar_lea.sflag [#allocation3], %s2858_s13  ;;  %s2156_s20 = scalar_lea.hbm %s2588_s12, 128 }
  0xa8   : > { %p2157_p13 = scmp.ne.s32.totalorder %s2588_s12, %s2156_s20  ;;  %p2859_p3 = scmp.ne.s32.totalorder %s2853_s23, 0 }
  0xa9   : > { %s2161_s22 = scalar_lea.hbm %s2803_s0, 256  ;;  %p2162_p1 = scmp.lt.u32.totalorder %s2588_s12, %s2803_s0 }
  0xaa   : > { %p2159_p11 = pnand %p2157_p13, %p2859_p3  ;;  %p2163_p8 = scmp.lt.u32.totalorder %s2161_s22, %s2156_s20 }
  0xab   : > { %p2165_p10 = scmp.lt.u32.totalorder %s2156_s20, %s2588_s12 }
  0xac   : > { %p2160_p6 = pneg %p2159_p11  ;;  %p2164_p5 = por %p2163_p8, %p2162_p1 }
  0xae   : > { %p2166_p2 = por %p2165_p10, %p2164_p5 }
  0xb0   : > { %p2167_p4 = pnand %p2166_p2, %p2160_p6 }
  0xb2   : > { %2170 = shalt.err (!%p2167_p4)
}
  0xb3   : > { %s2171_s3 = scalar_lea.vmem %s298_s28, 128  ;;  %s2303_s7 = smov [#allocation2]  }
  0xb4   : > { %p2172_p12 = scmp.ne.s32.totalorder %s298_s28, %s2171_s3  ;;  %s2176_s24 = sshll.u32 %s2303_s7, 4  ;;  %s2177_s24 = int_to_ptr.vmem [resolvable:$false] %s2176_s24 }
  0xb5   : > { %s2178_s17 = scalar_lea.vmem %s2177_s24, 256  ;;  %p2179_p9 = scmp.lt.s32.totalorder %s298_s28, %s2177_s24 }
  0xb6   : > { %p2174_p0 = pnand %p2172_p12, %p2859_p3  ;;  %p2180_p13 = scmp.lt.s32.totalorder %s2178_s17, %s2171_s3 }
  0xb8   : > { %p2175_p7 = pneg %p2174_p0  ;;  %p2181_p11 = por %p2180_p13, %p2179_p9 }
  0xba   : > { %p2182_p1 = pnand %p2181_p11, %p2175_p7 }
  0xbc   : > { %2185 = shalt.err (!%p2182_p1)
}
  0xbd   : > { %p2860_p8 = scmp.ne.s32.totalorder %s2851_s19, 0  ;;  %s2614_s13 = scalar_lea.hbm %s2805_s2, %s2493_s29 }
  0xbe   : > { %s326_s20 = scalar_lea.vmem [#allocation7], %s2490_s18  ;;  %s2186_s21 = scalar_lea.hbm %s2614_s13, 128 }
  0xbf   : > { %1930 = dma.hbm_to_vmem [thread:$0]  (!%p2860_p8), %s2588_s12, 128, %s298_s28, %s287_s9  }
  0xc0   : > { %s333_s1 = sshll.u32 %s326_s20, 4  ;;  %p2187_p6 = scmp.ne.s32.totalorder %s2614_s13, %s2186_s21  ;;  %s334_s1 = int_to_ptr.vmem [resolvable:$true] %s333_s1 }
  0xc1   : > { %s2191_s12 = scalar_lea.hbm %s2805_s2, 256  ;;  %p2192_p2 = scmp.lt.u32.totalorder %s2614_s13, %s2805_s2 }
  0xc2   : > { %p2189_p5 = pnand %p2187_p6, %p2859_p3  ;;  %p2193_p4 = scmp.lt.u32.totalorder %s2191_s12, %s2186_s21 }
  0xc3   : > { %p2195_p0 = scmp.lt.u32.totalorder %s2186_s21, %s2614_s13 }
  0xc4   : > { %p2190_p10 = pneg %p2189_p5  ;;  %p2194_p12 = por %p2193_p4, %p2192_p2 }
  0xc6   : > { %p2196_p7 = por %p2195_p0, %p2194_p12 }
  0xc8   : > { %p2197_p9 = pnand %p2196_p7, %p2190_p10 }
  0xca   : > { %2200 = shalt.err (!%p2197_p9)
}
  0xcb   : > { %s2201_s18 = scalar_lea.vmem %s334_s1, 128  ;;  %s2304_s29 = smov [#allocation7]  }
  0xcc   : > { %p2202_p13 = scmp.ne.s32.totalorder %s334_s1, %s2201_s18  ;;  %s2206_s27 = sshll.u32 %s2304_s29, 4  ;;  %s2207_s27 = int_to_ptr.vmem [resolvable:$false] %s2206_s27 }
  0xcd   : > { %s2208_s3 = scalar_lea.vmem %s2207_s27, 256  ;;  %p2209_p6 = scmp.lt.s32.totalorder %s334_s1, %s2207_s27 }
  0xce   : > { %p2204_p11 = pnand %p2202_p13, %p2859_p3  ;;  %p2210_p5 = scmp.lt.s32.totalorder %s2208_s3, %s2201_s18 }
  0xd0   : > { %p2205_p1 = pneg %p2204_p11  ;;  %p2211_p8 = por %p2210_p5, %p2209_p6 }
  0xd2   : > { %p2212_p2 = pnand %p2211_p8, %p2205_p1 }
  0xd4   : > { %2215 = shalt.err (!%p2212_p2)
}
  0xd5   : > { %p2861_p4 = scmp.ne.s32.totalorder %s2851_s19, 0  ;;  %p2862_p10 = scmp.ne.s32.totalorder %s2840_s8, 0 }
  0xd6   : > { %s2638_s23 = sand.u32 (!%p2862_p10), 1, %s2286_s25   ;;  %p2863_p3 = scmp.ne.s32.totalorder (!%p2862_p10), %s2847_s14, 0 }
  0xd7   : > { %1936 = dma.hbm_to_vmem [thread:$0]  (!%p2861_p4), %s2614_s13, 128, %s334_s1, %s2511_s5  }
  0xd8   : > { %342 = sbr.rel (%p2862_p10) target bundleno = 2336 (0x920), region = 48  ;;  %s2641_s7 = sshll.u32 (!%p2862_p10), %s2638_s23, 3 }
  0xd9   : > { %s345_s24 = scalar_lea.sflag (!%p2862_p10), [#allocation3], %s2638_s23  ;;  %s348_s17 = scalar_lea.vmem (!%p2862_p10), [#allocation2], %s2641_s7 }
  0xdf   : > { %2261 = dma.done.wait (%p2863_p3), %s345_s24, 128  }
  0xe0   : > { %2263 = vsyncadd (%p2863_p3), %s345_s24, 4294967168  ;;  %s353_s5 = sand.u32 1, %s2376_s30   ;;  %s357_s19 = scalar_lea.vmem [#allocation5], %s2641_s7 }
  0xe1   : > { %s354_s8 = scalar_lea.sflag [#allocation6], %s353_s5 }
  0xe2   : > { %2265 = dma.done.wait (%p2863_p3), %s354_s8, 256  }
  0xe3   : > { %2267 = vsyncadd (%p2863_p3), %s354_s8, 4294967040  ;;  %s366_s16 = scalar_lea.vmem [#allocation7], %s2641_s7  ;;  %p2864_p8 = scmp.eq.s32.totalorder %s2376_s30, 0 }
  0xe5   : > { %2269 = dma.done.wait (%p2864_p8), [#allocation9], 1024   ;;  %p2865_p12 = pmov %p2864_p8 }
  0xe6   : > { %p2866_p0 = pmov %p2864_p8 }
  0xe7   : > { %2271 = vsyncadd (%p2865_p12), [#allocation9], 4294966272 }
  0xe8   : > { %2273 = dma.done.wait (%p2866_p0), [#allocation12], 1024   ;;  %p2867_p7 = pmov %p2866_p0 }
  0xe9   : > { %v2305_v0 = vmov 0.0|0.0   ;;  %vm2306_vm0 = vmmov 0   ;;  %v2307_v1 = vmov 0.0   ;;  %v426_v2 = vld [vmem:[#allocation8] sm:$0xff]  ;;  %v427_v3 = vld [vmem:[#allocation8 + $0x8] sm:$0xff]  ;;  %v428_v4 = vld [vmem:[#allocation8 + $0x10] sm:$0xff] }
  0xea   : > { %2275 = vsyncadd (%p2867_p7), [#allocation12], 4294966272  ;;  %1866 = vmatprep.subr.bf16.mxu0 %v2305_v0  ;;  %1872 = vmatprep.subr.bf16.mxu1 %v2305_v0  ;;  %v1867_v5 = vpack.c.bf16 %v427_v3, %v426_v2  ;;  %v429_v6 = vld [vmem:[#allocation8 + $0x18] sm:$0xff]  ;;  %v504_v7 = vld [vmem:[#allocation10] sm:$0xff]  ;;  %vm430_vm1 = vcmask 261120   ;;  %vm659_vm2 = vcmask 64512  }
  0xeb   : > { %1790 = vmatprep.mubr.msk.f32.mxu0 %vm2306_vm0, %v2307_v1  ;;  %1801 = vmatprep.mubr.msk.f32.mxu1 %vm2306_vm0, %v2307_v1  ;;  %v505_v8 = vld [vmem:[#allocation10 + $0x8] sm:$0xff]  ;;  %v506_v10 = vld [vmem:[#allocation10 + $0x10] sm:$0xff]  ;;  %v507_v11 = vld [vmem:[#allocation10 + $0x18] sm:$0xff]  ;;  %v1870_v12 = vpack.c.bf16 %v429_v6, %v428_v4  ;;  %s2308_s14 = smov 120   ;;  %s2309_s11 = smov 112   ;;  %vm1457_vm3 = vcmask 130048  }
  0xec   : > { %v1873_v9 = vpack.c.bf16 %v505_v8, %v504_v7  ;;  %1868 = vmatpush3.bf16.msra.mxu0 %v1867_v5  ;;  %v1876_v13 = vpack.c.bf16 %v507_v11, %v506_v10  ;;  %v423_v14 = vld [vmem:[%s348_s17] sm:$0xff]  ;;  %v424_v15 = vld [vmem:[%s357_s19] sm:$0xff]  ;;  %s2310_s13 = smov 104   ;;  %s2311_s20 = smov 8   ;;  %vm1459_vm4 = vcmask 195584  }
  0xed   : > { %1869 = vmatprep.subr.bf16.mxu0 %v2305_v0  ;;  %v581_v24 = vld [vmem:[#allocation11] sm:$0xff]  ;;  %v582_v25 = vld [vmem:[#allocation11 + $0x8] sm:$0xff]  ;;  %v583_v26 = vld [vmem:[#allocation11 + $0x10] sm:$0xff]  ;;  %s2312_s1 = smov 16   ;;  %s2313_s21 = smov 24  }
  0xee   : > { %1874 = vmatpush3.bf16.msra.mxu1 %v1873_v9  ;;  %v1879_v27 = vpack.c.bf16 %v582_v25, %v581_v24  ;;  %v584_v28 = vld [vmem:[#allocation11 + $0x18] sm:$0xff]  ;;  %s1743_s22 = sshll.u32 %s2376_s30, 7  ;;  %s422_s10 = scalar_lea.vmem [#allocation14], %s2641_s7 }
  0xef   : > { %1875 = vmatprep.subr.bf16.mxu1 %v2305_v0  ;;  %v1882_v29 = vpack.c.bf16 %v584_v28, %v583_v26  ;;  %v425_v30 = vld [vmem:[%s366_s16] sm:$0xff]  ;;  %v1462_v28 = vld [vmem:[#allocation13 + $0x8] sm:$0xff]  ;;  %s1553_s12 = sshll.u32 %s422_s10, 4  ;;  %s2868_s18 = sld [smem:[#allocation28_spill]]  ;;  %s2760_s12 = int_to_ptr.vmem [resolvable:$true] %s1553_s12 }
  0xf0   : > { %1871 = vmatpush3.bf16.msra.mxu0 %v1870_v12  ;;  %s1540_s27 = scalar_lea.sflag [#allocation4], %s2638_s23  ;;  %s2216_s3 = scalar_lea.vmem %s2760_s12, 128 }
  0xf1   : > { %1878 = vmatprep.subr.bf16.mxu0 %v2305_v0  ;;  %p2217_p9 = scmp.ne.s32.totalorder %s2760_s12, %s2216_s3  ;;  %p2869_p13 = scmp.ne.s32.totalorder %s2848_s15, 0 }
  0xf2   : > { %1877 = vmatpush3.bf16.msra.mxu1 %v1876_v13  ;;  %s2314_s30 = smov [#allocation14]  }
  0xf3   : > { %1815 = vmatprep.subr.mxu1 %v2307_v1  ;;  %1791 = vmatmul.mubr.msk.f32.vlgmr.msra.gmra.mrb[0].mxu0 %vm430_vm1, %v423_v14  ;;  %p2218_p11 = pnand %p2217_p9, %p2869_p13  ;;  %s2220_s7 = sshll.u32 %s2314_s30, 4  ;;  %s2221_s7 = int_to_ptr.vmem [resolvable:$false] %s2220_s7 }
  0xf4   : > { %1812 = vmatprep.mubr.msk.f32.mxu0 %vm2306_vm0, %v2307_v1  ;;  %1880 = vmatpush3.bf16.msra.mxu0 %v1879_v27  ;;  %v1461_v27 = vld [vmem:[#allocation13] sm:$0xff]  ;;  %s2222_s24 = scalar_lea.vmem %s2221_s7, 256  ;;  %p2223_p6 = scmp.lt.s32.totalorder %s2760_s12, %s2221_s7 }
  0xf5   : > { %1802 = vmatmul.mubr.msk.f32.vlgmr.msra.gmra.mrb[0].mxu1 %vm430_vm1, %v424_v15  ;;  %1881 = vmatprep.subr.bf16.mxu0 %v2305_v0  ;;  %s2758_s29 = scalar_lea.hbm %s2868_s18, %s1743_s22  ;;  %p2219_p1 = pneg %p2218_p11 }
  0xf6   : > { %1817 = vmatprep.mubr.msk.f32.mxu1 %vm2306_vm0, %v2307_v1  ;;  %p2224_p5 = scmp.lt.s32.totalorder %s2222_s24, %s2216_s3 }
  0xf8   : > { %1883 = vmatpush3.bf16.msra.mxu0 %v1882_v29  ;;  %v1885_v29 = vpack.c.bf16 %v1462_v28, %v1461_v27  ;;  %p2225_p2 = por %p2224_p5, %p2223_p6 }
  0xf9   : > { %1835 = vmatprep.subr.mxu0 %v2307_v1 }
  0xfa   : > { %p2226_p4 = pnand %p2225_p2, %p2219_p1 }
  0xfb   : > { %1813 = vmatmul.mubr.msk.f32.vlgmr.msra.gmra.mrb[2].mxu0 %vm430_vm1, %v425_v30  ;;  %v1463_v30 = vld [vmem:[#allocation13 + $0x10] sm:$0xff] }
  0xfc   : > { %1837 = vmatprep.mubr.msk.f32.mxu0 %vm2306_vm0, %v2307_v1 }
 0x1c6   : > { %v500_v16 = vpop.f32.mrb[0].mxu0 }
 0x1c7   : > { %v658_v17 = vmul.f32 0.35355338, %v500_v16  ;;  %v1792_v18 = vpop.f32.mrb[1].mxu0 }
 0x1c8   : > { %v577_v19 = vpop.f32.mrb[0].mxu1 }
 0x1c9   : > { %v1803_v20 = vpop.f32.mrb[1].mxu1  ;;  %854 = vrot.lane.b32.xlu1 %v658_v17, %s2308_s14  ;;  %1816 = vmatpush3.xpose.msk.msra.mxu1 %vm659_vm2, %v658_v17 }
 0x1ca   : > { %1820 = vmatprep.subr.mxu1 %v2307_v1 }
 0x1cc   : > { %1818 = vmatmul.mubr.msk.f32.vlgmr.msra.gmra.mrb[2].mxu1 %vm659_vm2, %v577_v19 }
 0x1cd   : > { %852 = vrot.lane.b32.xlu1 %v577_v19, %s2308_s14  ;;  %1822 = vmatprep.mubr.msk.f32.mxu1 %vm2306_vm0, %v2307_v1 }
 0x1ce   : > { %v2704_v36 = vpop.f32.mrb[2].mxu0 }
 0x1cf   : > { %v1814_v37 = vpop.f32.mrb[3].mxu0  ;;  %1821 = vmatpush3.msra.mxu1 %v2704_v36 }
 0x1d0   : > { %1825 = vmatprep.subr.mxu1 %v2307_v1 }
 0x1d1   : > { %1050 = vrot.lane.b32.xlu1 %v577_v19, %s2309_s11 }
 0x1d5   : > { %1249 = vrot.lane.b32.xlu1 %v658_v17, %s2310_s13 }
 0x1d9   : > { %1247 = vrot.lane.b32.xlu1 %v577_v19, %s2310_s13 }
 0x23b   : > { %v855_v38 = vpop.permute.xlu1 %854 }
 0x23f   : > { %v853_v39 = vpop.permute.xlu1 %852 }
 0x243   : > { %v1051_v40 = vpop.permute.xlu1 %1050 }
 0x247   : > { %v1250_v43 = vpop.permute.xlu1 %1249 }
 0x24b   : > { %v1248_v45 = vpop.permute.xlu1 %1247 }
 0x29f   : > { %v732_v21 = vpop.f32.mrb[2].mxu1 }
 0x2a0   : > { %v1819_v22 = vpop.f32.mrb[3].mxu1  ;;  %v736_v23 = vsel %vm659_vm2, %v732_v21, -inf }
 0x2a1   : > { %737 = vmax.xlane.f32.xlu0 %v736_v23 }
 0x32e   : > { %v738_v31 = vpop.xlane.xlu0 %737 }
 0x32f   : > { %v739_v32 = vsub.f32 %v732_v21, %v738_v31  ;;  %v1464_v31 = vld [vmem:[#allocation13 + $0x18] sm:$0xff] }
 0x331   : > { %v740_v33 = vmul.f32 1.442695, %v739_v32  ;;  %v1888_v32 = vpack.c.bf16 %v1464_v31, %v1463_v30 }
 0x333   : > { %1998 = vpow2.f32 %v740_v33 }
 0x33d   : > { %v1999_v34 = vpop.eup %1998 }
 0x33e   : > { %v742_v35 = vsel %vm659_vm2, %v1999_v34, 0.0 }
 0x33f   : > { %743 = vadd.xlane.f32.xlu0 %v742_v35 }
 0x355   : > { %1052 = vrot.lane.b32.xlu0 %v658_v17, %s2309_s11 }
 0x3cc   : > { %v744_v41 = vpop.xlane.xlu0 %743 }
 0x3cd   : > { %2000 = vrcp.f32 %v744_v41 }
 0x3d0   : > { %v1053_v42 = vpop.permute.xlu0 %1052 }
 0x3d1   : > { %1836 = vmatpush3.xpose.msk.msra.mxu0 %vm659_vm2, %v1053_v42 }
 0x3d2   : > { %1845 = vmatprep.subr.mxu0 %v2307_v1 }
 0x3d4   : > { %1838 = vmatmul.mubr.msk.f32.vlgmr.msra.gmra.mrb[4].mxu0 %vm659_vm2, %v1051_v40 }
 0x3d5   : > { %1846 = vmatpush3.xpose.msk.msra.mxu0 %vm659_vm2, %v1250_v43  ;;  %1847 = vmatprep.mubr.msk.f32.mxu0 %vm2306_vm0, %v2307_v1 }
 0x3d6   : > { %1884 = vmatprep.subr.bf16.mxu0 %v2305_v0 }
 0x3d7   : > { %v2001_v44 = vpop.eup %2000 }
 0x3d8   : > { %1848 = vmatmul.mubr.msk.f32.vlgmr.msra.gmra.mrb[6].mxu0 %vm659_vm2, %v1248_v45  ;;  %v746_v46 = vmul.f32 %v2001_v44, %v1999_v34 }
 0x3d9   : > { %1863 = vmatprep.mubr.msk.f32.mxu0 %vm2306_vm0, %v2307_v1  ;;  %1886 = vmatpush3.bf16.msra.mxu0 %v1885_v29 }
 0x3da   : > { %747 = vxpose.xlu1.b32.start.end [1/1] (short) (narrow) %v746_v46, 8  ;;  %1887 = vmatprep.subr.bf16.mxu0 %v2305_v0 }
 0x3dd   : > { %1889 = vmatpush3.bf16.msra.mxu0 %v1888_v32 }
 0x45a   : > { %v763_v47 = vpop.trf.xlu1 }
 0x45b   : > { %1823 = vmatmul.mubr.msk.f32.vlgmr.msra.gmra.mrb[4].mxu1 %vm659_vm2, %v763_v47 }
 0x45c   : > { %1826 = vmatpush3.xpose.msk.msra.mxu1 %vm659_vm2, %v855_v38  ;;  %1827 = vmatprep.mubr.msk.f32.mxu1 %vm2306_vm0, %v2307_v1 }
 0x45d   : > { %1830 = vmatprep.subr.mxu1 %v2307_v1 }
 0x45f   : > { %1828 = vmatmul.mubr.msk.f32.vlgmr.msra.gmra.mrb[6].mxu1 %vm659_vm2, %v853_v39 }
 0x460   : > { %1832 = vmatprep.mubr.msk.f32.mxu1 %vm2306_vm0, %v2307_v1 }
 0x4a7   : > { %v1124_v48 = vpop.f32.mrb[4].mxu0 }
 0x4a8   : > { %v1839_v49 = vpop.f32.mrb[5].mxu0  ;;  %v1128_v58 = vsel %vm659_vm2, %v1124_v48, -inf }
 0x4ab   : > { %v1321_v50 = vpop.f32.mrb[6].mxu0 }
 0x4ac   : > { %v1849_v51 = vpop.f32.mrb[7].mxu0  ;;  %v1325_v52 = vsel %vm659_vm2, %v1321_v50, -inf }
 0x4ad   : > { %1326 = vmax.xlane.f32.xlu1 %v1325_v52 }
 0x4be   : > { %1368 = vrot.lane.b32.xlu1 %v2704_v36, %s2310_s13 }
 0x52e   : > { %v2729_v53 = vpop.f32.mrb[4].mxu1 }
 0x52f   : > { %v1824_v54 = vpop.f32.mrb[5].mxu1 }
 0x532   : > { %v926_v55 = vpop.f32.mrb[6].mxu1 }
 0x533   : > { %v1829_v56 = vpop.f32.mrb[7].mxu1  ;;  %v930_v57 = vsel %vm659_vm2, %v926_v55, -inf }
 0x534   : > { %931 = vmax.xlane.f32.xlu0 %v930_v57 }
 0x538   : > { %1129 = vmax.xlane.f32.xlu0 %v1128_v58 }
 0x53a   : > { %v1327_v59 = vpop.xlane.xlu1 %1326 }
 0x53b   : > { %v1328_v62 = vsub.f32 %v1321_v50, %v1327_v59 }
 0x53d   : > { %v1329_v4 = vmul.f32 1.442695, %v1328_v62 }
 0x53e   : > { %v1369_v23 = vpop.permute.xlu1 %1368 }
 0x5c1   : > { %v932_v60 = vpop.xlane.xlu0 %931 }
 0x5c2   : > { %v933_v61 = vsub.f32 %v926_v55, %v932_v60 }
 0x5c4   : > { %v934_v63 = vmul.f32 1.442695, %v933_v61 }
 0x5c5   : > { %v1130_v2 = vpop.xlane.xlu0 %1129 }
 0x5c6   : > { %2002 = vpow2.f32 %v934_v63  ;;  %v1131_v3 = vsub.f32 %v1124_v48, %v1130_v2 }
 0x5c8   : > { %v1132_v5 = vmul.f32 1.442695, %v1131_v3 }
 0x5ca   : > { %2004 = vpow2.f32 %v1132_v5 }
 0x5cb   : > { %2006 = vpow2.f32 %v1329_v4 }
 0x5d0   : > { %v2003_v6 = vpop.eup %2002 }
 0x5d1   : > { %v936_v7 = vsel %vm659_vm2, %v2003_v6, 0.0 }
 0x5d2   : > { %937 = vadd.xlane.f32.xlu0 %v936_v7 }
 0x5d4   : > { %v2005_v8 = vpop.eup %2004 }
 0x5d5   : > { %v1134_v9 = vsel %vm659_vm2, %v2005_v8, 0.0  ;;  %v2007_v10 = vpop.eup %2006 }
 0x5d6   : > { %1135 = vadd.xlane.f32.xlu0 %v1134_v9  ;;  %v1331_v11 = vsel %vm659_vm2, %v2007_v10, 0.0 }
 0x5da   : > { %1332 = vadd.xlane.f32.xlu0 %v1331_v11 }
 0x5f0   : > { %974 = vrot.lane.b32.xlu0 %v2704_v36, %s2308_s14 }
 0x5f4   : > { %1171 = vrot.lane.b32.xlu0 %v2704_v36, %s2309_s11 }
 0x65f   : > { %v938_v12 = vpop.xlane.xlu0 %937 }
 0x660   : > { %2008 = vrcp.f32 %v938_v12 }
 0x663   : > { %v1136_v13 = vpop.xlane.xlu0 %1135 }
 0x664   : > { %2010 = vrcp.f32 %v1136_v13 }
 0x667   : > { %v1333_v14 = vpop.xlane.xlu0 %1332 }
 0x668   : > { %2012 = vrcp.f32 %v1333_v14 }
 0x66a   : > { %v2009_v15 = vpop.eup %2008 }
 0x66b   : > { %v975_v16 = vpop.permute.xlu0 %974  ;;  %v940_v17 = vmul.f32 %v2009_v15, %v2003_v6 }
 0x66c   : > { %1831 = vmatpush3.msra.mxu1 %v975_v16 }
 0x66d   : > { %941 = vxpose.xlu0.b32.start.end [1/1] (short) (narrow) %v940_v17, 8  ;;  %1840 = vmatprep.subr.mxu1 %v2307_v1 }
 0x66e   : > { %v2011_v18 = vpop.eup %2010 }
 0x66f   : > { %v1138_v19 = vmul.f32 %v2011_v18, %v2005_v8  ;;  %v1172_v22 = vpop.permute.xlu0 %1171 }
 0x671   : > { %1139 = vxpose.xlu1.b32.start.end [1/1] (short) (narrow) %v1138_v19, 8 }
 0x672   : > { %v2013_v20 = vpop.eup %2012 }
 0x673   : > { %v1335_v21 = vmul.f32 %v2013_v20, %v2007_v10 }
 0x675   : > { %1336 = vxpose.xlu0.b32.start.end [1/1] (short) (narrow) %v1335_v21, 8 }
 0x6ed   : > { %v957_v24 = vpop.trf.xlu0 }
 0x6ee   : > { %1833 = vmatmul.mubr.msk.f32.vlgmr.msra.gmra.mrb[8].mxu1 %vm659_vm2, %v957_v24 }
 0x6ef   : > { %1841 = vmatpush3.msra.mxu1 %v1172_v22  ;;  %1842 = vmatprep.mubr.msk.f32.mxu1 %vm2306_vm0, %v2307_v1 }
 0x6f0   : > { %1850 = vmatprep.subr.mxu1 %v2307_v1 }
 0x6f1   : > { %v1155_v25 = vpop.trf.xlu1 }
 0x6f2   : > { %1843 = vmatmul.mubr.msk.f32.vlgmr.msra.gmra.mrb[10].mxu1 %vm659_vm2, %v1155_v25 }
 0x6f3   : > { %1851 = vmatpush3.msra.mxu1 %v1369_v23  ;;  %1852 = vmatprep.mubr.msk.f32.mxu1 %vm2306_vm0, %v2307_v1 }
 0x6f5   : > { %v1352_v26 = vpop.trf.xlu0 }
 0x6f6   : > { %1853 = vmatmul.mubr.msk.f32.vlgmr.msra.gmra.mrb[12].mxu1 %vm659_vm2, %v1352_v26 }
 0x7c1   : > { %v1046_v33 = vpop.f32.mrb[8].mxu1 }
 0x7c2   : > { %1445 = vrot.lane.b32.xlu0 %v1046_v33, %s2311_s20  ;;  %v1834_v34 = vpop.f32.mrb[9].mxu1 }
 0x7c5   : > { %v1243_v35 = vpop.f32.mrb[10].mxu1 }
 0x7c6   : > { %1449 = vrot.lane.b32.xlu1 %v1243_v35, %s2312_s1  ;;  %v1844_v1 = vpop.f32.mrb[11].mxu1 }
 0x7c9   : > { %v1440_v36 = vpop.f32.mrb[12].mxu1 }
 0x7ca   : > { %1453 = vrot.lane.b32.xlu0 %v1440_v36, %s2313_s21  ;;  %v1854_v37 = vpop.f32.mrb[13].mxu1 }
 0x834   : > { %v1446_v38 = vpop.permute.xlu0 %1445 }
 0x835   : > { %v1456_v39 = vsel %vm659_vm2, %v2729_v53, %v1446_v38 }
 0x838   : > { %v1450_v0 = vpop.permute.xlu1 %1449 }
 0x839   : > { %v1458_v40 = vsel %vm1457_vm3, %v1456_v39, %v1450_v0 }
 0x83c   : > { %v1454_v41 = vpop.permute.xlu0 %1453 }
 0x83d   : > { %v1460_v42 = vsel %vm1459_vm4, %v1458_v40, %v1454_v41 }
 0x83e   : > { %1864 = vmatmul.mubr.msk.f32.vlgmr.msra.gmra.mrb[8].mxu0 %vm430_vm1, %v1460_v42 }
 0x911   : > { %v1534_v43 = vpop.f32.mrb[8].mxu0 }
 0x912   : > { %1538 = vst.msk [vmem:[%s422_s10] sm:$0xff] %vm430_vm1, %v1534_v43  ;;  %v1865_v44 = vpop.f32.mrb[9].mxu0 }
 0x913   : > { %2229 = shalt.err (!%p2226_p4)
}
 0x914   : > { %s2230_s23 = scalar_lea.hbm %s2758_s29, 128  ;;  %s2234_s8 = scalar_lea.hbm %s2868_s18, 256 }
 0x915   : > { %p2231_p10 = scmp.ne.s32.totalorder %s2758_s29, %s2230_s23  ;;  %p2235_p12 = scmp.lt.u32.totalorder %s2758_s29, %s2868_s18 }
 0x916   : > { %p2236_p0 = scmp.lt.u32.totalorder %s2234_s8, %s2230_s23  ;;  %p2238_p9 = scmp.lt.u32.totalorder %s2230_s23, %s2758_s29 }
 0x917   : > { %p2232_p3 = pnand %p2231_p10, %p2869_p13 }
 0x918   : > { %p2237_p7 = por %p2236_p0, %p2235_p12 }
 0x919   : > { %p2233_p8 = pneg %p2232_p3 }
 0x91a   : > { %p2239_p11 = por %p2238_p9, %p2237_p7 }
 0x91c   : > { %p2240_p1 = pnand %p2239_p11, %p2233_p8 }
 0x91e   : > { %2243 = shalt.err (!%p2240_p1)
}
 0x91f   : > { %1912 = dma.vmem_to_hbm [thread:$0]  (%p2869_p13), %s2760_s12, 128, %s2758_s29, %s1540_s27  }
 0x920 PF: > { %s2870_s14 = sld [smem:[#allocation20_spill]]  ;;  %s2871_s11 = sld [smem:[#allocation24_spill]] }
 0x921   : > { %s2872_s13 = sld [smem:[#allocation21_spill]] }
 0x926   : > { %s1565_s20 = sand.u32 1, %s2870_s14   ;;  %p2873_p6 = scmp.ne.s32.totalorder %s2871_s11, 0 }
 0x927   : > { %p2874_p5 = scmp.ge.s32.totalorder %s2872_s13, 2  ;;  %s1566_s1 = scalar_lea.sflag [#allocation4], %s1565_s20 }
 0x929   : > { %p1938_p2 = pnand %p2874_p5, %p2873_p6 }
 0x92b   : > { %2277 = dma.done.wait (!%p1938_p2), %s1566_s1, 128  }
 0x92c   : > { %2279 = vsyncadd (!%p1938_p2), %s1566_s1, 4294967168  ;;  %s2875_s27 = sld [smem:[#allocation22_spill]]  ;;  %s2876_s21 = sld [smem:[#allocation23_spill]] }
 0x92d   : > { %s2877_s24 = smov %s2286_s25  ;;  %s2878_s25 = smov %s2290_s26 }
 0x932   : > { %p25_p4 = scmp.ge.s32.totalorder %s2875_s27, 4   ;;  %s2879_s26 = smov %s2876_s21 }
 0x934   :  { %27 = sbr.rel (!%p25_p4) target bundleno = 14 (0xe), region = 133 }
 0x93b   :  { %1571 = vsyncpa [#allocation3], 1 }
 0x93c   :  { %1573 = vsyncpa [#allocation3 + $0x1], 1 }
 0x93d   :  { %1574 = vsyncpa [#allocation6], 1 }
 0x93e   :  { %1576 = vsyncpa [#allocation6 + $0x1], 1 }
 0x93f   :  { %1577 = vsyncpa [#allocation9], 1 }
 0x940   :  { %1578 = vsyncpa [#allocation12], 1 }
 0x941   :  { %1579 = vsyncpa [#allocation4], 1 }
 0x942   :  { %1581 = vsyncpa [#allocation4 + $0x1], 1 }

</bundles_post_ra>
